<compile_context>
chip_gen: v7x
topology: tpu7x:2x2x1
jax: 0.10.0
libtpu: 0.0.40
codegen_flags: <defaults>
</compile_context>

<pallas_src>
import jax
import jax.numpy as jnp
from jax.experimental import pallas as pl
from jax.experimental.pallas import tpu as pltpu

N = 50                 # hardcoded 0:50 slicing in forward()
EMB = 300              # hardcoded embedding_shape = (50, 300)
D_ENC = 2 * EMB + 2    # 602 encoder output width
FFN_IN = 2 * EMB + 1   # 601 (hardcoded Linear(601, ffn_hidden_size))
H = 64                 # ffn_hidden_size (small, synthetic)
OUT = 1                # num_tasks = 1 (regression)
H2 = 2 * H             # 128: fused hidden width [h12 | h21]
MOLFRAC_COL = 2 * EMB  # 600: mol_frac1 column in the encoder output
T_COL = 2 * EMB + 1    # 601: temperature column


def ffn_kernel(slab_ref, f1_ref, c0_ref, c1_ref, wp_ref, b1_ref, w2_ref,
               b2_ref, out_ref):
    # slab (N,602) | f1 (N,1) | c0,c1 (1,602) | wp (602,128) | b1 (1,128)
    # w2 (1,128) with the mean's 0.5 pre-folded | b2 (1,) SMEM | out (N,1)

    # Column-dependent mixing as an affine form (pure VPU mul/add, no selects):
    #   cols [0,300)   -> f1
    #   cols [300,600) -> 1 - f1
    #   col 600        -> 0   (dead: wp row 600 is zero anyway)
    #   col 601 (T)    -> 1
    scale = c0_ref[...] + c1_ref[...] * f1_ref[...]            # (N, 602)
    x = slab_ref[...] * scale

    # Single fused MXU matmul: [h12 | h21] pre-activation; bias added after.
    h = jnp.dot(x, wp_ref[...], preferred_element_type=jnp.float32)
    h = jnp.maximum(h + b1_ref[...], 0.0)                      # (N, 128)

    # mean(concat([o12, o21], 1)) with OUT == 1 and 0.5 folded into w2:
    #   out = sum(relu(H) * [0.5*w2 | 0.5*w2], lanes) + b2
    out_ref[...] = jnp.sum(h * w2_ref[...], axis=-1, keepdims=True) + b2_ref[0]


def pack_ffn_params(w1, b1, w2, b2):
    """One-time, model-load-time packing of the FFN parameters.

    Returns (wp, b1row, w2row, b2s, c0, c1); none of this runs per forward.
    """
    f32 = jnp.float32
    w1 = w1.astype(f32)
    w1a, w1b, w1t = w1[:EMB], w1[EMB:2 * EMB], w1[2 * EMB:2 * EMB + 1]
    wp = jnp.concatenate([
        jnp.concatenate([w1a, w1b], axis=1),    # rows   0:300 (embedding1)
        jnp.concatenate([w1b, w1a], axis=1),    # rows 300:600 (embedding2)
        jnp.zeros((1, H2), f32),                # row 600: mol_frac col -> 0
        jnp.concatenate([w1t, w1t], axis=1),    # row 601: temperature term
    ], axis=0)                                  # (602, 128)

    b1r = b1.reshape(1, H).astype(f32)
    b1row = jnp.concatenate([b1r, b1r], axis=1)                 # (1, 128)

    w2r = (0.5 * w2.reshape(1, H)).astype(f32)                  # fold mean's 0.5
    w2row = jnp.concatenate([w2r, w2r], axis=1)                 # (1, 128)
    b2s = b2.reshape(1).astype(f32)                             # (1,) SMEM scalar

    col = jnp.arange(D_ENC)
    c0 = ((((col >= EMB) & (col < 2 * EMB)) | (col == T_COL))
          .astype(f32).reshape(1, D_ENC))
    c1 = jnp.where(col < EMB, 1.0,
                   jnp.where(col < 2 * EMB, -1.0, 0.0)).astype(f32).reshape(1, D_ENC)
    return wp, b1row, w2row, b2s, c0, c1


@jax.jit
def molecule_model_forward(embedding_combined, wp, b1row, w2row, b2s, c0, c1):
    """embedding_combined: (50, 602) float32. Returns (50, 1) float32."""
    emb = embedding_combined[:N].astype(jnp.float32)            # (50, 602)
    f1 = emb[:, MOLFRAC_COL:MOLFRAC_COL + 1]                    # (50, 1)

    vmem = pl.BlockSpec(memory_space=pltpu.MemorySpace.VMEM)
    smem = pl.BlockSpec(memory_space=pltpu.MemorySpace.SMEM)
    bytes_accessed = 4 * (N * D_ENC + N + 2 * D_ENC + D_ENC * H2
                          + 2 * H2 + 1 + N * OUT)               # ~440 KiB
    out = pl.pallas_call(
        ffn_kernel,
        out_shape=jax.ShapeDtypeStruct((N, OUT), jnp.float32),
        in_specs=[vmem, vmem, vmem, vmem, vmem, vmem, vmem, smem],
        out_specs=vmem,
        cost_estimate=pl.CostEstimate(
            flops=2 * N * D_ENC * H2 + 4 * N * D_ENC + 3 * N * H2,
            transcendentals=0,
            bytes_accessed=bytes_accessed),
    )(emb, f1, c0, c1, wp, b1row, w2row, b2s)
    return out


def reference_forward(embedding_combined, w1, b1, w2, b2):
    """Pure-JAX reference mirroring the PyTorch forward (eval mode)."""
    T = embedding_combined[:N, -1:].astype(jnp.float32)
    f1 = embedding_combined[:N, -2:-1]
    f2 = 1.0 - f1
    e1 = embedding_combined[:N, :EMB]
    e2 = embedding_combined[:N, EMB:-2]
    x12 = jnp.concatenate([e1 * f1, e2 * f2, T], axis=1)
    x21 = jnp.concatenate([e2 * f2, e1 * f1, T], axis=1)

    def ffn(x):
        h = jnp.maximum(x @ w1 + b1, 0.0)
        return h @ w2 + b2

    o12, o21 = ffn(x12), ffn(x21)
    return jnp.mean(jnp.concatenate([o12, o21], axis=1), axis=1).reshape(-1, 1)


if __name__ == "__main__":
    key = jax.random.PRNGKey(0)
    k_emb, k_w1, k_b1, k_w2, k_b2 = jax.random.split(key, 5)

    # Synthetic encoder output: [N, 602]; mol_frac1 column kept in [0, 1].
    emb = jax.random.normal(k_emb, (N, D_ENC), dtype=jnp.float32)
    frac = jax.nn.sigmoid(emb[:, MOLFRAC_COL:MOLFRAC_COL + 1])
    emb = emb.at[:, MOLFRAC_COL:MOLFRAC_COL + 1].set(frac)

    # Deterministic synthetic FFN parameters (Linear(601,H), Linear(H,1)).
    w1 = jax.random.normal(k_w1, (FFN_IN, H), dtype=jnp.float32) / jnp.sqrt(FFN_IN)
    b1 = jax.random.normal(k_b1, (H,), dtype=jnp.float32) * 0.01
    w2 = jax.random.normal(k_w2, (H, OUT), dtype=jnp.float32) / jnp.sqrt(H)
    b2 = jax.random.normal(k_b2, (OUT,), dtype=jnp.float32) * 0.01

    # One-time (model-load) packing, OUTSIDE the per-call forward.
    packed = jax.block_until_ready(pack_ffn_params(w1, b1, w2, b2))
    wp, b1row, w2row, b2s, c0, c1 = packed

    out = jax.block_until_ready(
        molecule_model_forward(emb, wp, b1row, w2row, b2s, c0, c1))
    ref = jax.block_until_ready(reference_forward(emb, w1, b1, w2, b2))

    assert out.shape == (N, 1), out.shape
    assert jnp.allclose(out, ref, atol=1e-4, rtol=1e-4), float(
        jnp.max(jnp.abs(out - ref)))
    print("KERNEL_OK")
</pallas_src>

<mosaic_0001>
module attributes {stable_mosaic.version = 11 : i64} {
  func.func @ffn_kernel(%arg0: memref<50x602xf32, #tpu.memory_space<vmem>>, %arg1: memref<50x1xf32, #tpu.memory_space<vmem>>, %arg2: memref<1x602xf32, #tpu.memory_space<vmem>>, %arg3: memref<1x602xf32, #tpu.memory_space<vmem>>, %arg4: memref<602x128xf32, #tpu.memory_space<vmem>>, %arg5: memref<1x128xf32, #tpu.memory_space<vmem>>, %arg6: memref<1x128xf32, #tpu.memory_space<vmem>>, %arg7: memref<1xf32, #tpu.memory_space<smem>>, %arg8: memref<50x1xf32, #tpu.memory_space<vmem>>) attributes {dimension_semantics = [], scalar_prefetch = 0 : i64, scratch_operands = 0 : i64, tpu.core_type = #tpu.core_type<tc>} {
    %c0 = arith.constant 0 : index
    %c0_0 = arith.constant 0 : index
    %0 = vector.load %arg2[%c0, %c0_0] : memref<1x602xf32, #tpu.memory_space<vmem>>, vector<1x602xf32>
    %c0_1 = arith.constant 0 : index
    %c0_2 = arith.constant 0 : index
    %1 = vector.load %arg3[%c0_1, %c0_2] : memref<1x602xf32, #tpu.memory_space<vmem>>, vector<1x602xf32>
    %c0_3 = arith.constant 0 : index
    %c0_4 = arith.constant 0 : index
    %2 = vector.load %arg1[%c0_3, %c0_4] : memref<50x1xf32, #tpu.memory_space<vmem>>, vector<50x1xf32>
    %3 = vector.broadcast %1 : vector<1x602xf32> to vector<50x602xf32>
    %4 = vector.broadcast %2 : vector<50x1xf32> to vector<50x602xf32>
    %5 = arith.mulf %3, %4 : vector<50x602xf32>
    %6 = vector.broadcast %0 : vector<1x602xf32> to vector<50x602xf32>
    %7 = arith.addf %6, %5 : vector<50x602xf32>
    %c0_5 = arith.constant 0 : index
    %c0_6 = arith.constant 0 : index
    %8 = vector.load %arg0[%c0_5, %c0_6] : memref<50x602xf32, #tpu.memory_space<vmem>>, vector<50x602xf32>
    %9 = arith.mulf %8, %7 : vector<50x602xf32>
    %c0_7 = arith.constant 0 : index
    %c0_8 = arith.constant 0 : index
    %10 = vector.load %arg4[%c0_7, %c0_8] : memref<602x128xf32, #tpu.memory_space<vmem>>, vector<602x128xf32>
    %cst = arith.constant dense<0.000000e+00> : vector<50x128xf32>
    %11 = tpu.matmul %9, %10, %cst {dimension_numbers = #tpu.dot_dimension_numbers<[1], [0], [0], [1], [0, 0, 1, 1], [], []>} : vector<50x602xf32>, vector<602x128xf32>, vector<50x128xf32> -> vector<50x128xf32>
    %c0_9 = arith.constant 0 : index
    %c0_10 = arith.constant 0 : index
    %12 = vector.load %arg5[%c0_9, %c0_10] : memref<1x128xf32, #tpu.memory_space<vmem>>, vector<1x128xf32>
    %13 = vector.broadcast %12 : vector<1x128xf32> to vector<50x128xf32>
    %14 = arith.addf %11, %13 : vector<50x128xf32>
    %cst_11 = arith.constant 0.000000e+00 : f32
    %15 = vector.broadcast %cst_11 : f32 to vector<50x128xf32>
    %16 = arith.maximumf %14, %15 : vector<50x128xf32>
    %c0_12 = arith.constant 0 : index
    %c0_13 = arith.constant 0 : index
    %17 = vector.load %arg6[%c0_12, %c0_13] : memref<1x128xf32, #tpu.memory_space<vmem>>, vector<1x128xf32>
    %18 = vector.broadcast %17 : vector<1x128xf32> to vector<50x128xf32>
    %19 = arith.mulf %16, %18 : vector<50x128xf32>
    %cst_14 = arith.constant dense<0.000000e+00> : vector<50xf32>
    %20 = vector.multi_reduction <add>, %19, %cst_14 [1] : vector<50x128xf32> to vector<50xf32>
    %21 = vector.shape_cast %20 : vector<50xf32> to vector<50x1xf32>
    %c0_15 = arith.constant 0 : index
    %22 = memref.load %arg7[%c0_15] : memref<1xf32, #tpu.memory_space<smem>>
    %23 = vector.broadcast %22 : f32 to vector<50x1xf32>
    %24 = arith.addf %21, %23 : vector<50x1xf32>
    %c0_16 = arith.constant 0 : index
    %c0_17 = arith.constant 0 : index
    %25 = vector.load %arg8[%c0_16, %c0_17] : memref<50x1xf32, #tpu.memory_space<vmem>>, vector<50x1xf32>
    tpu.vector_store %arg8[%c0_16, %c0_17], %24 {strides = array<i32>} : memref<50x1xf32, #tpu.memory_space<vmem>>, vector<50x1xf32>,
    return
  }
}

</mosaic_0001>

<bundles_post_ra>
// kernel: molecule_model_forward.1
= control target key start
LH: loop header
LB: loop body
LE: loop exit
PB: predicated region body
PF: predicated region fallthrough
CT: control target
= control target key end

     0   :  { %14 = vsyncpa [#allocation4], 0  ;;  %s1429_s0 = inlined_call_operand.hbm [shape: f32[50,602], index: 0, kind: input, shape index: {}]   ;;  %s1430_s1 = inlined_call_operand.vmem [shape: f32[50,1], index: 1, kind: input, shape index: {}]   ;;  %s1431_s2 = inlined_call_operand.vmem [shape: f32[1,602], index: 2, kind: input, shape index: {}]   ;;  %s1432_s3 = inlined_call_operand.vmem [shape: f32[1,602], index: 3, kind: input, shape index: {}]   ;;  %s1433_s4 = inlined_call_operand.hbm [shape: f32[602,128], index: 4, kind: input, shape index: {}]   ;;  %s1434_s5 = inlined_call_operand.vmem [shape: f32[1,128], index: 5, kind: input, shape index: {}]   ;;  %s1435_s6 = inlined_call_operand.vmem [shape: f32[1,128], index: 6, kind: input, shape index: {}]   ;;  %s1436_s7 = inlined_call_operand.<no memory space> [shape: f32[1], index: 7, kind: input, shape index: {}]   ;;  %s1437_s8 = inlined_call_operand.vmem [shape: f32[50,1], index: 8, kind: output, shape index: {}]  }
   0x1   :  { %15 = vsyncpa [#allocation6], 0  ;;  %s1099_s27 = smov [#allocation3]   ;;  %s1051_s9 = scalar_lea.hbm %s1429_s0, 4480 }
   0x2   :  { %s21_s28 = sshll.u32 %s1099_s27, 4  ;;  %p1052_p0 = scmp.ne.s32.totalorder %s1429_s0, %s1051_s9  ;;  %s22_s28 = int_to_ptr.vmem [resolvable:$true] %s21_s28 }
   0x3   :  { %p1055_p1 = scmp.lt.u32.totalorder %s1051_s9, %s1429_s0 }
   0x5   :  { %p1057_p2 = pnand %p1055_p1, %p1052_p0 }
   0x7   :  { %1060 = shalt.err (!%p1057_p2)
}
   0x8   :  { %s1061_s14 = scalar_lea.vmem %s22_s28, 4480  ;;  %p1066_p4 = scmp.lt.s32.totalorder %s22_s28, %s22_s28 }
   0x9   :  { %p1062_p3 = scmp.ne.s32.totalorder %s22_s28, %s1061_s14  ;;  %p1067_p5 = scmp.lt.s32.totalorder %s1061_s14, %s1061_s14 }
   0xb   :  { %p1068_p6 = por %p1067_p5, %p1066_p4 }
   0xd   :  { %p1069_p7 = pnand %p1068_p6, %p1062_p3 }
   0xf   :  { %1072 = shalt.err (!%p1069_p7)
}
  0x10   :  { %s1100_s15 = smov 640   ;;  %s1101_s16 = smov 40  }
  0x11   :  { %27 = dma.hbm_to_vmem [thread:$0]  %s1429_s0, 4480, %s22_s28, [#allocation4], %s1100_s15, %s1100_s15, %s1101_s16  }
  0x12   :  { %s1102_s19 = smov [#allocation5]   ;;  %s1073_s23 = scalar_lea.hbm %s1433_s4, 9728 }
  0x13   :  { %s39_s20 = sshll.u32 %s1102_s19, 4  ;;  %p1074_p8 = scmp.ne.s32.totalorder %s1433_s4, %s1073_s23  ;;  %s40_s20 = int_to_ptr.vmem [resolvable:$true] %s39_s20 }
  0x14   :  { %p1077_p9 = scmp.lt.u32.totalorder %s1073_s23, %s1433_s4 }
  0x16   :  { %p1079_p10 = pnand %p1077_p9, %p1074_p8 }
  0x18   :  { %1082 = shalt.err (!%p1079_p10)
}
  0x19   :  { %s1083_s29 = scalar_lea.vmem %s40_s20, 9728  ;;  %p1088_p12 = scmp.lt.s32.totalorder %s40_s20, %s40_s20 }
  0x1a   :  { %p1084_p11 = scmp.ne.s32.totalorder %s40_s20, %s1083_s29  ;;  %p1089_p13 = scmp.lt.s32.totalorder %s1083_s29, %s1083_s29 }
  0x1c   :  { %p1090_p0 = por %p1089_p13, %p1088_p12 }
  0x1e   :  { %p1091_p1 = pnand %p1090_p0, %p1084_p11 }
  0x20   :  { %1094 = shalt.err (!%p1091_p1)
}
  0x21   :  { %s1103_s0 = smov 128   ;;  %s1104_s28 = smov 8  }
  0x22   :  { %45 = dma.hbm_to_vmem [thread:$0]  %s1433_s4, 9728, %s40_s20, [#allocation6], %s1103_s0, %s1103_s0, %s1104_s28  }
  0x23   :  { %1095 = dma.done.wait [#allocation4], 4480  }
  0x24   :  { %1096 = vsyncadd [#allocation4], 4294962816 }
  0x25   :  { %1097 = dma.done.wait [#allocation6], 9728  }
  0x26   :  { %1098 = vsyncadd [#allocation6], 4294957568  ;;  %v1105_v0 = vmov 0   ;;  %v62_v1 = vld [vmem:[%s1430_s1 + $0x10] sm:$0xff]  ;;  %v60_v2 = vld [vmem:[%s1430_s1] sm:$0xff]  ;;  %vm399_vm0 = vcmask 1041408  }
  0x27   :  { %1050 = vset.pattern.permute.xlu1 %v1105_v0  ;;  %1049 = vset.pattern.permute.xlu0 %v1105_v0  ;;  %v63_v3 = vld [vmem:[%s1430_s1 + $0x18] sm:$0xff]  ;;  %v61_v4 = vld [vmem:[%s1430_s1 + $0x8] sm:$0xff]  ;;  %v311_v6 = vld [vmem:[#allocation5 + $0x88] sm:$0xff]  ;;  %vm1107_vm1 = vmmov 1   ;;  %vm1108_vm3 = vmmov 0   ;;  %vm377_vm4 = vcmask 736256  }
  0x28   :  { %105 = vperm.xlu1 %1050, %v62_v1   ;;  %95 = vperm.xlu0 %1049, %v60_v2   ;;  %v310_v5 = vld [vmem:[#allocation5 + $0x80] sm:$0xff]  ;;  %v295_v9 = vld [vmem:[#allocation5 + $0x8] sm:$0xff]  ;;  %v65_v11 = vld [vmem:[%s1430_s1 + $0x28] sm:$0xff]  ;;  %vm748_vm5 = vcmask 7168   ;;  %vm755_vm6 = vcmask 1024  }
  0x29   :  { %v943_v7 = vpack.c.bf16 %v311_v6, %v310_v5  ;;  %v294_v8 = vld [vmem:[#allocation5] sm:$0xff]  ;;  %v64_v12 = vld [vmem:[%s1430_s1 + $0x20] sm:$0xff]  ;;  %v312_v19 = vld [vmem:[#allocation5 + $0x90] sm:$0xff] }
  0x2a   :  { %v342_v10 = vld [vmem:[#allocation5 + $0x180] sm:$0xff]  ;;  %v945_v13 = vpack.c.bf16 %v295_v9, %v294_v8  ;;  %v343_v14 = vld [vmem:[#allocation5 + $0x188] sm:$0xff]  ;;  %v313_v20 = vld [vmem:[#allocation5 + $0x98] sm:$0xff] }
  0x2b   :  { %v326_v15 = vld [vmem:[#allocation5 + $0x100] sm:$0xff]  ;;  %v327_v16 = vld [vmem:[#allocation5 + $0x108] sm:$0xff]  ;;  %v975_v17 = vpack.c.bf16 %v343_v14, %v342_v10  ;;  %v296_v21 = vld [vmem:[#allocation5 + $0x10] sm:$0xff]  ;;  %944 = vmatprep.subr.bf16.mxu0 %v943_v7  ;;  %v947_v22 = vpack.c.bf16 %v313_v20, %v312_v19 }
  0x2c   :  { %110 = vperm.xlu1 %1050, %v63_v3   ;;  %100 = vperm.xlu0 %1049, %v61_v4   ;;  %v977_v18 = vpack.c.bf16 %v327_v16, %v326_v15  ;;  %v297_v23 = vld [vmem:[#allocation5 + $0x18] sm:$0xff]  ;;  %v344_v24 = vld [vmem:[#allocation5 + $0x190] sm:$0xff]  ;;  %v314_v30 = vld [vmem:[#allocation5 + $0xa0] sm:$0xff] }
  0x2d   :  { %v345_v25 = vld [vmem:[#allocation5 + $0x198] sm:$0xff]  ;;  %946 = vmatpush3.bf16.msra.mxu0 %v945_v13  ;;  %976 = vmatprep.subr.bf16.mxu1 %v975_v17  ;;  %v949_v26 = vpack.c.bf16 %v297_v23, %v296_v21  ;;  %v328_v28 = vld [vmem:[#allocation5 + $0x110] sm:$0xff]  ;;  %v315_v33 = vld [vmem:[#allocation5 + $0xa8] sm:$0xff] }
  0x2e   :  { %v979_v27 = vpack.c.bf16 %v345_v25, %v344_v24  ;;  %v329_v29 = vld [vmem:[#allocation5 + $0x118] sm:$0xff]  ;;  %978 = vmatpush3.bf16.msra.mxu1 %v977_v18  ;;  %948 = vmatprep.subr.bf16.mxu0 %v947_v22  ;;  %v298_v34 = vld [vmem:[#allocation5 + $0x20] sm:$0xff]  ;;  %v299_v35 = vld [vmem:[#allocation5 + $0x28] sm:$0xff]  ;;  %v951_v36 = vpack.c.bf16 %v315_v33, %v314_v30 }
  0x2f   :  { %v66_v31 = vld [vmem:[%s1430_s1 + $0x30] sm:$0x3]  ;;  %v981_v32 = vpack.c.bf16 %v329_v29, %v328_v28  ;;  %v346_v37 = vld [vmem:[#allocation5 + $0x1a0] sm:$0xff]  ;;  %v347_v38 = vld [vmem:[#allocation5 + $0x1a8] sm:$0xff]  ;;  %v953_v44 = vpack.c.bf16 %v299_v35, %v298_v34 }
  0x30   :  { %120 = vperm.xlu1 %1050, %v65_v11   ;;  %115 = vperm.xlu0 %1049, %v64_v12   ;;  %v330_v39 = vld [vmem:[#allocation5 + $0x120] sm:$0xff]  ;;  %v983_v40 = vpack.c.bf16 %v347_v38, %v346_v37  ;;  %v331_v41 = vld [vmem:[#allocation5 + $0x128] sm:$0xff]  ;;  %v316_v42 = vld [vmem:[#allocation5 + $0xb0] sm:$0xff] }
  0x31   :  { %980 = vmatprep.subr.bf16.mxu1 %v979_v27  ;;  %v317_v43 = vld [vmem:[#allocation5 + $0xb8] sm:$0xff]  ;;  %950 = vmatpush3.bf16.msra.mxu0 %v949_v26  ;;  %v300_v45 = vld [vmem:[#allocation5 + $0x30] sm:$0xff]  ;;  %v985_v47 = vpack.c.bf16 %v331_v41, %v330_v39  ;;  %v318_v54 = vld [vmem:[#allocation5 + $0xc0] sm:$0xff]  ;;  %v68_v41 = vlaneseq }
  0x32   :  { %v348_v46 = vld [vmem:[#allocation5 + $0x1b0] sm:$0xff]  ;;  %982 = vmatpush3.bf16.msra.mxu1 %v981_v32  ;;  %952 = vmatprep.subr.bf16.mxu0 %v951_v36  ;;  %v955_v48 = vpack.c.bf16 %v317_v43, %v316_v42  ;;  %v301_v49 = vld [vmem:[#allocation5 + $0x38] sm:$0xff]  ;;  %v319_v55 = vld [vmem:[#allocation5 + $0xc8] sm:$0xff] }
  0x33   :  { %v349_v50 = vld [vmem:[#allocation5 + $0x1b8] sm:$0xff]  ;;  %v332_v51 = vld [vmem:[#allocation5 + $0x130] sm:$0xff]  ;;  %984 = vmatprep.subr.bf16.mxu1 %v983_v40  ;;  %v350_v56 = vld [vmem:[#allocation5 + $0x1c0] sm:$0xff]  ;;  %v957_v58 = vpack.c.bf16 %v301_v49, %v300_v45  ;;  %v959_v60 = vpack.c.bf16 %v319_v55, %v318_v54  ;;  %v1106_v40 = vmov 0.0|0.0   ;;  %v69_v42 = vshrl.u32 %v68_v41, 7 }
  0x34   :  { %125 = vperm.xlu0 %1049, %v66_v31   ;;  %v987_v52 = vpack.c.bf16 %v349_v50, %v348_v46  ;;  %v333_v53 = vld [vmem:[#allocation5 + $0x138] sm:$0xff]  ;;  %v351_v57 = vld [vmem:[#allocation5 + $0x1c8] sm:$0xff]  ;;  %v302_v61 = vld [vmem:[#allocation5 + $0x40] sm:$0xff] }
  0x35   :  { %954 = vmatpush3.bf16.msra.mxu0 %v953_v44  ;;  %v989_v59 = vpack.c.bf16 %v333_v53, %v332_v51  ;;  %v303_v62 = vld [vmem:[#allocation5 + $0x48] sm:$0xff]  ;;  %v334_v63 = vld [vmem:[#allocation5 + $0x140] sm:$0xff]  ;;  %v991_v0 = vpack.c.bf16 %v351_v57, %v350_v56  ;;  %v320_v2 = vld [vmem:[#allocation5 + $0xd0] sm:$0xff]  ;;  %v74_v43 = vsub.s32 1, %v69_v42  ;;  %v82_v44 = vsub.s32 3, %v69_v42 }
  0x36   :  { %986 = vmatpush3.bf16.msra.mxu1 %v985_v47  ;;  %956 = vmatprep.subr.bf16.mxu0 %v955_v48  ;;  %v335_v1 = vld [vmem:[#allocation5 + $0x148] sm:$0xff]  ;;  %v321_v3 = vld [vmem:[#allocation5 + $0xd8] sm:$0xff]  ;;  %v352_v4 = vld [vmem:[#allocation5 + $0x1d0] sm:$0xff]  ;;  %v961_v6 = vpack.c.bf16 %v303_v62, %v302_v61  ;;  %v70_v46 = vsub.s32 0, %v69_v42  ;;  %v78_v47 = vsub.s32 2, %v69_v42  ;;  %v86_v55 = vsub.s32 4, %v69_v42 }
  0x37   :  { %988 = vmatprep.subr.bf16.mxu1 %v987_v52  ;;  %v353_v5 = vld [vmem:[#allocation5 + $0x1d8] sm:$0xff]  ;;  %v993_v7 = vpack.c.bf16 %v335_v1, %v334_v63  ;;  %v963_v8 = vpack.c.bf16 %v321_v3, %v320_v2  ;;  %v304_v9 = vld [vmem:[#allocation5 + $0x50] sm:$0xff]  ;;  %v322_v14 = vld [vmem:[#allocation5 + $0xe0] sm:$0xff] }
  0x38   :  { %v305_v10 = vld [vmem:[#allocation5 + $0x58] sm:$0xff]  ;;  %v336_v11 = vld [vmem:[#allocation5 + $0x150] sm:$0xff]  ;;  %v995_v12 = vpack.c.bf16 %v353_v5, %v352_v4  ;;  %v323_v15 = vld [vmem:[#allocation5 + $0xe8] sm:$0xff] }
  0x39   :  { %958 = vmatpush3.bf16.msra.mxu0 %v957_v58  ;;  %v337_v13 = vld [vmem:[#allocation5 + $0x158] sm:$0xff]  ;;  %v354_v16 = vld [vmem:[#allocation5 + $0x1e0] sm:$0xff]  ;;  %v355_v17 = vld [vmem:[#allocation5 + $0x1e8] sm:$0xff]  ;;  %v965_v18 = vpack.c.bf16 %v305_v10, %v304_v9  ;;  %v967_v20 = vpack.c.bf16 %v323_v15, %v322_v14 }
  0x3a   :  { %990 = vmatpush3.bf16.msra.mxu1 %v989_v59  ;;  %960 = vmatprep.subr.bf16.mxu0 %v959_v60  ;;  %v997_v19 = vpack.c.bf16 %v337_v13, %v336_v11  ;;  %v306_v21 = vld [vmem:[#allocation5 + $0x60] sm:$0xff]  ;;  %v307_v22 = vld [vmem:[#allocation5 + $0x68] sm:$0xff]  ;;  %v999_v24 = vpack.c.bf16 %v355_v17, %v354_v16  ;;  %v324_v26 = vld [vmem:[#allocation5 + $0xf0] sm:$0xff] }
  0x3b   :  { %992 = vmatprep.subr.bf16.mxu1 %v991_v0  ;;  %v338_v23 = vld [vmem:[#allocation5 + $0x160] sm:$0xff]  ;;  %v339_v25 = vld [vmem:[#allocation5 + $0x168] sm:$0xff]  ;;  %v325_v27 = vld [vmem:[#allocation5 + $0xf8] sm:$0xff]  ;;  %v969_v30 = vpack.c.bf16 %v307_v22, %v306_v21 }
  0x3c   :  { %v356_v28 = vld [vmem:[#allocation5 + $0x1f0] sm:$0xff]  ;;  %v357_v29 = vld [vmem:[#allocation5 + $0x1f8] sm:$0xff]  ;;  %v1001_v31 = vpack.c.bf16 %v339_v25, %v338_v23  ;;  %v971_v32 = vpack.c.bf16 %v325_v27, %v324_v26  ;;  %v59_v45 = vld [vmem:[%s1432_s3] sm:$0x1f] }
  0x3d   :  { %962 = vmatpush3.bf16.msra.mxu0 %v961_v6  ;;  %v308_v33 = vld [vmem:[#allocation5 + $0x70] sm:$0xff]  ;;  %v309_v34 = vld [vmem:[#allocation5 + $0x78] sm:$0xff]  ;;  %v1003_v35 = vpack.c.bf16 %v357_v29, %v356_v28  ;;  %v58_v48 = vld [vmem:[%s1431_s2] sm:$0x1f]  ;;  %v1208_v49 = vrot.slane %v59_v45, %v74_v43  ;;  %v1210_v50 = vrot.slane %v59_v45, %v82_v44  ;;  %v1212_v51 = vrot.slane %v59_v45, %v70_v46 }
  0x3e   :  { %994 = vmatpush3.bf16.msra.mxu1 %v993_v7  ;;  %964 = vmatprep.subr.bf16.mxu0 %v963_v8  ;;  %v340_v36 = vld [vmem:[#allocation5 + $0x170] sm:$0xff]  ;;  %v341_v37 = vld [vmem:[#allocation5 + $0x178] sm:$0xff]  ;;  %v973_v38 = vpack.c.bf16 %v309_v34, %v308_v33  ;;  %v1214_v52 = vrot.slane %v59_v45, %v78_v47  ;;  %v1216_v53 = vrot.slane %v58_v48, %v74_v43  ;;  %v358_v1 = vld [vmem:[#allocation5 + $0x200] sm:$0xff] }
  0x3f   :  { %996 = vmatprep.subr.bf16.mxu1 %v995_v12  ;;  %v1005_v39 = vpack.c.bf16 %v341_v37, %v340_v36  ;;  %v1218_v54 = vrot.slane %v58_v48, %v82_v44  ;;  %v1222_v57 = vrot.slane %v58_v48, %v70_v46  ;;  %v1224_v58 = vrot.slane %v58_v48, %v78_v47  ;;  %v225_v62 = vld [vmem:[#allocation3 + $0x8] sm:$0xff]  ;;  %v359_v2 = vld [vmem:[#allocation5 + $0x208] sm:$0xff]  ;;  %v227_v6 = vld [vmem:[#allocation3 + $0x18] sm:$0xff] }
  0x40   :  { %v224_v7 = vld [vmem:[#allocation3] sm:$0xff]  ;;  %v226_v8 = vld [vmem:[#allocation3 + $0x10] sm:$0xff]  ;;  %v1242_v10 = vrot.slane %v59_v45, %v86_v55  ;;  %v1244_v11 = vrot.slane %v58_v48, %v86_v55  ;;  %v360_v15 = vld [vmem:[#allocation5 + $0x210] sm:$0xff]  ;;  %v1008_v17 = vpack.c.bf16 %v359_v2, %v358_v1 }
  0x41   :  { %966 = vmatpush3.bf16.msra.mxu0 %v965_v18  ;;  %v361_v18 = vld [vmem:[#allocation5 + $0x218] sm:$0xff]  ;;  %v362_v21 = vld [vmem:[#allocation5 + $0x220] sm:$0xff]  ;;  %v363_v22 = vld [vmem:[#allocation5 + $0x228] sm:$0xff] }
  0x42   :  { %998 = vmatpush3.bf16.msra.mxu1 %v997_v19  ;;  %968 = vmatprep.subr.bf16.mxu0 %v967_v20  ;;  %v364_v27 = vld [vmem:[#allocation5 + $0x230] sm:$0xff]  ;;  %v365_v28 = vld [vmem:[#allocation5 + $0x238] sm:$0xff]  ;;  %v1011_v36 = vpack.c.bf16 %v361_v18, %v360_v15  ;;  %v235_v37 = vld [vmem:[#allocation3 + $0x58] sm:$0xff] }
  0x43   :  { %1000 = vmatprep.subr.bf16.mxu1 %v999_v24  ;;  %v230_v29 = vld [vmem:[#allocation3 + $0x30] sm:$0xff]  ;;  %v229_v42 = vld [vmem:[#allocation3 + $0x28] sm:$0xff]  ;;  %v231_v43 = vld [vmem:[#allocation3 + $0x38] sm:$0xff]  ;;  %v1267_v45 = vpack.c.bf16 %v365_v28, %v364_v27 }
  0x44   :  { %v234_v55 = vld [vmem:[#allocation3 + $0x50] sm:$0xff]  ;;  %v241_v27 = vld [vmem:[#allocation3 + $0x88] sm:$0xff]  ;;  %vm1342_vm2 = vmpackc.low %vm399_vm0, %vm1107_vm1 }
  0x45   :  { %970 = vmatpush3.bf16.msra.mxu0 %v969_v30  ;;  %v242_v15 = vld [vmem:[#allocation3 + $0x90] sm:$0xff]  ;;  %v245_v28 = vld [vmem:[#allocation3 + $0xa8] sm:$0xff] }
  0x46   :  { %1002 = vmatpush3.bf16.msra.mxu1 %v1001_v31  ;;  %972 = vmatprep.subr.bf16.mxu0 %v971_v32 }
  0x47   :  { %1004 = vmatprep.subr.bf16.mxu1 %v1003_v35  ;;  %v232_v35 = vld [vmem:[#allocation3 + $0x40] sm:$0xff] }
  0x49   :  { %974 = vmatpush3.bf16.msra.mxu0 %v973_v38  ;;  %v237_v38 = vld [vmem:[#allocation3 + $0x68] sm:$0xff] }
  0x4a   :  { %1006 = vmatpush3.bf16.msra.mxu1 %v1005_v39  ;;  %1007 = vmatprep.subr.bf16.mxu0 %v1106_v40  ;;  %v1263_v39 = vpack.c.bf16 %v363_v22, %v362_v21  ;;  %v239_v21 = vld [vmem:[#allocation3 + $0x78] sm:$0xff] }
  0x4b   :  { %1026 = vmatprep.subr.bf16.mxu1 %v1106_v40 }
  0xa7   :  { %v1220_v56 = vpop.permute.xlu0 %95  ;;  %v1226_v59 = vpop.permute.xlu1 %105 }
  0xa8   :  { %v129_v60 = vmul.f32 %v1220_v56, %v1208_v49  ;;  %v131_v61 = vmul.f32 %v1220_v56, %v1210_v50  ;;  %v128_v63 = vmul.f32 %v1220_v56, %v1212_v51  ;;  %v130_v0 = vmul.f32 %v1220_v56, %v1214_v52 }
  0xa9   :  { %v139_v3 = vmul.f32 %v1226_v59, %v1208_v49  ;;  %v141_v9 = vmul.f32 %v1226_v59, %v1210_v50  ;;  %v138_v20 = vmul.f32 %v1226_v59, %v1212_v51  ;;  %v140_v2 = vmul.f32 %v1226_v59, %v1214_v52 }
  0xaa   :  { %v190_v4 = vadd.f32 %v1216_v53, %v129_v60  ;;  %v192_v5 = vadd.f32 %v1218_v54, %v131_v61  ;;  %v189_v13 = vadd.f32 %v1222_v57, %v128_v63  ;;  %v191_v14 = vadd.f32 %v1224_v58, %v130_v0  ;;  %v366_v60 = vld [vmem:[#allocation5 + $0x240] sm:$0xff]  ;;  %v367_v61 = vld [vmem:[#allocation5 + $0x248] sm:$0xff] }
  0xab   :  { %v1246_v12 = vpop.permute.xlu0 %100  ;;  %v200_v19 = vadd.f32 %v1216_v53, %v139_v3  ;;  %v202_v33 = vadd.f32 %v1218_v54, %v141_v9  ;;  %v199_v44 = vadd.f32 %v1222_v57, %v138_v20 }
  0xac   :  { %v260_v16 = vmul.f32 %v225_v62, %v190_v4  ;;  %v262_v23 = vmul.f32 %v227_v6, %v192_v5  ;;  %v259_v24 = vmul.f32 %v224_v7, %v189_v13  ;;  %v261_v25 = vmul.f32 %v226_v8, %v191_v14  ;;  %v1272_v62 = vpop.permute.xlu1 %110  ;;  %v236_v6 = vld [vmem:[#allocation3 + $0x60] sm:$0xff] }
  0xad   :  { %v134_v26 = vmul.f32 %v1246_v12, %v1208_v49  ;;  %v136_v30 = vmul.f32 %v1246_v12, %v1210_v50  ;;  %v133_v31 = vmul.f32 %v1246_v12, %v1212_v51  ;;  %v135_v32 = vmul.f32 %v1246_v12, %v1214_v52  ;;  %v240_v14 = vld [vmem:[#allocation3 + $0x80] sm:$0xff] }
  0xae   :  { %467 = vmatprep.mubr.f32.mxu0 %v260_v16  ;;  %567 = vmatprep.mubr.f32.mxu1 %v262_v23  ;;  %v270_v0 = vmul.f32 %v235_v37, %v200_v19  ;;  %v272_v1 = vmul.f32 %v237_v38, %v202_v33  ;;  %v144_v7 = vmul.f32 %v1272_v62, %v1208_v49 }
  0xaf   :  { %468 = vmatmul.mubr.f32.vlgmr.msra.gmra.mrb[0].mxu0 %v259_v24  ;;  %v195_v34 = vadd.f32 %v1216_v53, %v134_v26  ;;  %568 = vmatmul.mubr.f32.vlgmr.msra.gmra.mrb[0].mxu1 %v261_v25  ;;  %v197_v41 = vadd.f32 %v1218_v54, %v136_v30  ;;  %v194_v47 = vadd.f32 %v1222_v57, %v133_v31  ;;  %v1277_v3 = vpop.permute.xlu0 %115 }
  0xb0   :  { %1009 = vmatpush3.bf16.msra.mxu0 %v1008_v17  ;;  %v196_v48 = vadd.f32 %v1224_v58, %v135_v32  ;;  %1032 = vmatpush3.bf16.msra.mxu1 %v1008_v17  ;;  %v146_v8 = vmul.f32 %v1272_v62, %v1210_v50  ;;  %v269_v9 = vmul.f32 %v234_v55, %v199_v44  ;;  %v369_v44 = vld [vmem:[#allocation5 + $0x258] sm:$0x3] }
  0xb1   :  { %v265_v46 = vmul.f32 %v230_v29, %v195_v34  ;;  %1010 = vmatprep.subr.bf16.mxu0 %v1106_v40  ;;  %v267_v63 = vmul.f32 %v232_v35, %v197_v41  ;;  %1027 = vmatprep.subr.bf16.mxu1 %v1106_v40  ;;  %v264_v4 = vmul.f32 %v229_v42, %v194_v47  ;;  %v1296_v29 = vpop.permute.xlu1 %120  ;;  %v247_v34 = vld [vmem:[#allocation3 + $0xb8] sm:$0xff]  ;;  %v244_v42 = vld [vmem:[#allocation3 + $0xa0] sm:$0xff] }
  0xb2   :  { %v266_v5 = vmul.f32 %v231_v43, %v196_v48  ;;  %v201_v13 = vadd.f32 %v1224_v58, %v140_v2  ;;  %v1284_v16 = vpack.c.bf16 %v367_v61, %v366_v60  ;;  %v205_v17 = vadd.f32 %v1216_v53, %v144_v7  ;;  %v368_v43 = vld [vmem:[#allocation5 + $0x250] sm:$0xff]  ;;  %v246_v48 = vld [vmem:[#allocation3 + $0xb0] sm:$0xff] }
  0xb3   :  { %472 = vmatprep.mubr.f32.mxu0 %v265_v46  ;;  %572 = vmatprep.mubr.f32.mxu1 %v267_v63  ;;  %v207_v18 = vadd.f32 %v1218_v54, %v146_v8  ;;  %v143_v19 = vmul.f32 %v1272_v62, %v1212_v51  ;;  %v145_v22 = vmul.f32 %v1272_v62, %v1214_v52  ;;  %v1315_v60 = vpop.permute.xlu0 %125  ;;  %v250_v2 = vld [vmem:[#allocation3 + $0xd0] sm:$0xff] }
  0xb4   :  { %1012 = vmatpush3.bf16.msra.mxu0 %v1011_v36  ;;  %573 = vmatmul.mubr.f32.gmra.mrb[2].mxu1 %v266_v5  ;;  %v271_v20 = vmul.f32 %v236_v6, %v201_v13  ;;  %v149_v23 = vmul.f32 %v1277_v3, %v1208_v49  ;;  %v275_v24 = vmul.f32 %v240_v14, %v205_v17 }
  0xb5   :  { %473 = vmatmul.mubr.f32.gmra.mrb[2].mxu0 %v264_v4  ;;  %577 = vmatprep.mubr.f32.mxu1 %v272_v1  ;;  %v277_v25 = vmul.f32 %v242_v15, %v207_v18  ;;  %v204_v26 = vadd.f32 %v1222_v57, %v143_v19  ;;  %v206_v30 = vadd.f32 %v1224_v58, %v145_v22  ;;  %v252_v4 = vld [vmem:[#allocation3 + $0xe0] sm:$0xff]  ;;  %v249_v18 = vld [vmem:[#allocation3 + $0xc8] sm:$0xff] }
  0xb6   :  { %477 = vmatprep.mubr.f32.mxu0 %v270_v0  ;;  %1033 = vmatpush3.bf16.msra.mxu1 %v1011_v36  ;;  %v210_v31 = vadd.f32 %v1216_v53, %v149_v23  ;;  %v151_v32 = vmul.f32 %v1277_v3, %v1210_v50  ;;  %v148_v35 = vmul.f32 %v1277_v3, %v1212_v51  ;;  %v257_v22 = vld [vmem:[#allocation3 + $0x108] sm:$0x3] }
  0xb7   :  { %1013 = vmatprep.subr.bf16.mxu0 %v1106_v40  ;;  %1028 = vmatprep.subr.bf16.mxu1 %v1106_v40  ;;  %v274_v33 = vmul.f32 %v239_v21, %v204_v26  ;;  %v150_v36 = vmul.f32 %v1277_v3, %v1214_v52  ;;  %v276_v37 = vmul.f32 %v241_v27, %v206_v30  ;;  %v255_v21 = vld [vmem:[#allocation3 + $0xf8] sm:$0x3]  ;;  %v254_v30 = vld [vmem:[#allocation3 + $0xf0] sm:$0x3] }
  0xb8   :  { %1015 = vmatpush3.bf16.msra.mxu0 %v1263_v39  ;;  %578 = vmatmul.mubr.f32.gmra.mrb[4].mxu1 %v271_v20  ;;  %v280_v38 = vmul.f32 %v245_v28, %v210_v31  ;;  %v212_v41 = vadd.f32 %v1218_v54, %v151_v32  ;;  %v209_v46 = vadd.f32 %v1222_v57, %v148_v35  ;;  %v251_v20 = vld [vmem:[#allocation3 + $0xd8] sm:$0xff]  ;;  %v256_v31 = vld [vmem:[#allocation3 + $0x100] sm:$0x3]  ;;  %v1109_v35 = vmov 0.0  }
  0xb9   :  { %478 = vmatmul.mubr.f32.gmra.mrb[4].mxu0 %v269_v9  ;;  %582 = vmatprep.mubr.f32.mxu1 %v277_v25  ;;  %v211_v47 = vadd.f32 %v1224_v58, %v150_v36  ;;  %v154_v55 = vmul.f32 %v1296_v29, %v1208_v49  ;;  %v153_v63 = vmul.f32 %v1296_v29, %v1212_v51 }
  0xba   :  { %482 = vmatprep.mubr.f32.mxu0 %v275_v24  ;;  %1034 = vmatpush3.bf16.msra.mxu1 %v1263_v39  ;;  %v282_v61 = vmul.f32 %v247_v34, %v212_v41  ;;  %v156_v39 = vmul.f32 %v1296_v29, %v1210_v50  ;;  %v279_v0 = vmul.f32 %v244_v42, %v209_v46  ;;  %v233_v41 = vld [vmem:[#allocation3 + $0x48] sm:$0xff] }
  0xbb   :  { %1016 = vmatprep.subr.bf16.mxu0 %v1106_v40  ;;  %1029 = vmatprep.subr.bf16.mxu1 %v1106_v40  ;;  %v215_v1 = vadd.f32 %v1216_v53, %v154_v55  ;;  %v1023_v5 = vpack.c.bf16 %v369_v44, %v368_v43  ;;  %v281_v6 = vmul.f32 %v246_v48, %v211_v47  ;;  %v253_v42 = vld [vmem:[#allocation3 + $0xe8] sm:$0xff]  ;;  %v238_v48 = vld [vmem:[#allocation3 + $0x70] sm:$0xff] }
  0xbc   :  { %1018 = vmatpush3.bf16.msra.mxu0 %v1267_v45  ;;  %583 = vmatmul.mubr.f32.gmra.mrb[6].mxu1 %v276_v37  ;;  %v217_v7 = vadd.f32 %v1218_v54, %v156_v39  ;;  %v155_v8 = vmul.f32 %v1296_v29, %v1214_v52  ;;  %v214_v9 = vadd.f32 %v1222_v57, %v153_v63  ;;  %v258_v55 = vld [vmem:[#allocation3 + $0x110] sm:$0x3] }
  0xbd   :  { %483 = vmatmul.mubr.f32.gmra.mrb[6].mxu0 %v274_v33  ;;  %587 = vmatprep.mubr.f32.mxu1 %v282_v61  ;;  %v159_v13 = vmul.f32 %v1315_v60, %v1208_v49  ;;  %v161_v14 = vmul.f32 %v1315_v60, %v1210_v50  ;;  %v285_v15 = vmul.f32 %v250_v2, %v215_v1  ;;  %v248_v33 = vld [vmem:[#allocation3 + $0xc0] sm:$0xff]  ;;  %v243_v61 = vld [vmem:[#allocation3 + $0x98] sm:$0xff] }
  0xbe   :  { %487 = vmatprep.mubr.f32.mxu0 %v280_v38  ;;  %1035 = vmatpush3.bf16.msra.mxu1 %v1267_v45  ;;  %v287_v17 = vmul.f32 %v252_v4, %v217_v7  ;;  %v216_v19 = vadd.f32 %v1224_v58, %v155_v8  ;;  %v158_v50 = vmul.f32 %v1315_v60, %v1212_v51  ;;  %v763_v1 = vld [vmem:[%s1434_s5] ss:$0 sm:$0xff] }
  0xbf   :  { %1019 = vmatprep.subr.bf16.mxu0 %v1106_v40  ;;  %1030 = vmatprep.subr.bf16.mxu1 %v1106_v40  ;;  %v220_v45 = vadd.f32 %v1216_v53, %v159_v13  ;;  %v222_v49 = vadd.f32 %v1218_v54, %v161_v14  ;;  %v132_v24 = vmul.f32 %v1220_v56, %v1242_v10 }
  0xc0   :  { %1021 = vmatpush3.bf16.msra.mxu0 %v1284_v16  ;;  %588 = vmatmul.mubr.f32.gmra.mrb[8].mxu1 %v281_v6  ;;  %v152_v25 = vmul.f32 %v1277_v3, %v1242_v10  ;;  %v160_v53 = vmul.f32 %v1315_v60, %v1214_v52  ;;  %v284_v54 = vmul.f32 %v249_v18, %v214_v9 }
  0xc1   :  { %488 = vmatmul.mubr.f32.gmra.mrb[8].mxu0 %v279_v0  ;;  %592 = vmatprep.mubr.f32.mxu1 %v287_v17  ;;  %v286_v26 = vmul.f32 %v251_v20, %v216_v19  ;;  %v219_v51 = vadd.f32 %v1222_v57, %v158_v50  ;;  %v290_v27 = vmul.f32 %v255_v21, %v220_v45  ;;  %v228_v57 = vld [vmem:[#allocation3 + $0x20] sm:$0xff] }
  0xc2   :  { %492 = vmatprep.mubr.f32.mxu0 %v285_v15  ;;  %1036 = vmatpush3.bf16.msra.mxu1 %v1284_v16  ;;  %v292_v28 = vmul.f32 %v257_v22, %v222_v49  ;;  %v221_v56 = vadd.f32 %v1224_v58, %v160_v53  ;;  %v193_v52 = vadd.f32 %v1244_v11, %v132_v24 }
  0xc3   :  { %1022 = vmatprep.subr.bf16.mxu0 %v1106_v40  ;;  %1031 = vmatprep.subr.bf16.mxu1 %v1106_v40  ;;  %v137_v3 = vmul.f32 %v1246_v12, %v1242_v10  ;;  %v157_v16 = vmul.f32 %v1296_v29, %v1242_v10  ;;  %v213_v58 = vadd.f32 %v1244_v11, %v152_v25 }
  0xc4   :  { %1025 = vmatpush3.bf16.msk.msra.mxu0 %vm1342_vm2, %v1023_v5  ;;  %593 = vmatmul.mubr.f32.gmra.mrb[10].mxu1 %v286_v26  ;;  %v289_v32 = vmul.f32 %v254_v30, %v219_v51  ;;  %v291_v40 = vmul.f32 %v256_v31, %v221_v56  ;;  %v142_v34 = vmul.f32 %v1226_v59, %v1242_v10 }
  0xc5   :  { %493 = vmatmul.mubr.f32.gmra.mrb[10].mxu0 %v284_v54  ;;  %597 = vmatprep.mubr.f32.mxu1 %v292_v28  ;;  %v263_v12 = vmul.f32 %v228_v57, %v193_v52  ;;  %v283_v29 = vmul.f32 %v248_v33, %v213_v58  ;;  %v162_v36 = vmul.f32 %v1315_v60, %v1242_v10 }
  0xc6   :  { %497 = vmatprep.mubr.f32.mxu0 %v290_v27  ;;  %1037 = vmatpush3.bf16.msk.msra.mxu1 %vm1342_vm2, %v1023_v5  ;;  %v198_v37 = vadd.f32 %v1244_v11, %v137_v3  ;;  %v218_v38 = vadd.f32 %v1244_v11, %v157_v16  ;;  %v147_v59 = vmul.f32 %v1272_v62, %v1242_v10 }
  0xc7   :  { %v203_v46 = vadd.f32 %v1244_v11, %v142_v34  ;;  %v223_v47 = vadd.f32 %v1244_v11, %v162_v36 }
  0xc8   :  { %598 = vmatmul.mubr.f32.gmra.mrb[12].mxu1 %v291_v40  ;;  %v268_v43 = vmul.f32 %v233_v41, %v198_v37  ;;  %v288_v44 = vmul.f32 %v253_v42, %v218_v38  ;;  %v208_v60 = vadd.f32 %v1244_v11, %v147_v59 }
  0xc9   :  { %498 = vmatmul.mubr.f32.gmra.mrb[12].mxu0 %v289_v32  ;;  %934 = vmatprep.mubr.msk.f32.mxu1 %vm1108_vm3, %v1109_v35  ;;  %v273_v10 = vmul.f32 %v238_v48, %v203_v46  ;;  %v293_v62 = vmul.f32 %v258_v55, %v223_v47 }
  0xca   :  { %922 = vmatprep.mubr.msk.f32.mxu0 %vm1108_vm3, %v1109_v35  ;;  %v278_v39 = vmul.f32 %v243_v61, %v208_v60  ;;  %v772_v61 = vld [vmem:[%s1435_s6] ss:$0 sm:$0xff] }
  0xcc   :  { %935 = vmatmul.mubr.msk.f32.vlgmr.msra.gmra.mrb[14].mxu1 %vm377_vm4, %v283_v29 }
  0xcd   :  { %923 = vmatmul.mubr.msk.f32.vlgmr.msra.gmra.mrb[14].mxu0 %vm377_vm4, %v263_v12  ;;  %937 = vmatprep.mubr.msk.f32.mxu1 %vm1108_vm3, %v1109_v35 }
  0xce   :  { %925 = vmatprep.mubr.msk.f32.mxu0 %vm1108_vm3, %v1109_v35 }
  0xd0   :  { %938 = vmatmul.mubr.msk.f32.gmra.mrb[16].mxu1 %vm377_vm4, %v288_v44 }
  0xd1   :  { %926 = vmatmul.mubr.msk.f32.gmra.mrb[16].mxu0 %vm377_vm4, %v268_v43  ;;  %940 = vmatprep.mubr.msk.f32.mxu1 %vm1108_vm3, %v1109_v35 }
  0xd2   :  { %928 = vmatprep.mubr.msk.f32.mxu0 %vm1108_vm3, %v1109_v35 }
  0xd4   :  { %941 = vmatmul.mubr.msk.f32.gmra.mrb[18].mxu1 %vm377_vm4, %v293_v62 }
  0xd5   :  { %929 = vmatmul.mubr.msk.f32.gmra.mrb[18].mxu0 %vm377_vm4, %v273_v10 }
  0xd6   :  { %931 = vmatprep.mubr.msk.f32.mxu0 %vm1108_vm3, %v1109_v35 }
  0xd9   :  { %932 = vmatmul.mubr.msk.f32.gmra.mrb[20].mxu0 %vm377_vm4, %v278_v39 }
 0x182   :  { %v805_v63 = vpop.f32.mrb[0].mxu0  ;;  %v858_v0 = vpop.f32.mrb[0].mxu1 }
 0x183   :  { %v806_v2 = vpop.f32.mrb[1].mxu0  ;;  %v859_v5 = vpop.f32.mrb[1].mxu1 }
 0x184   :  { %v807_v4 = vadd.f32 %v806_v2, %v805_v63  ;;  %v860_v11 = vadd.f32 %v859_v5, %v858_v0 }
 0x186   :  { %v470_v6 = vadd.f32 %v807_v4, %v763_v1 }
 0x187   :  { %v861_v8 = vpop.f32.mrb[2].mxu1 }
 0x188   :  { %v808_v7 = vpop.f32.mrb[2].mxu0  ;;  %v570_v9 = vadd.f32 %v860_v11, %v470_v6  ;;  %v862_v14 = vpop.f32.mrb[3].mxu1 }
 0x189   :  { %v809_v13 = vpop.f32.mrb[3].mxu0  ;;  %v863_v17 = vadd.f32 %v862_v14, %v861_v8 }
 0x18a   :  { %v810_v15 = vadd.f32 %v809_v13, %v808_v7 }
 0x18b   :  { %v864_v20 = vpop.f32.mrb[4].mxu1 }
 0x18c   :  { %v475_v18 = vadd.f32 %v810_v15, %v763_v1  ;;  %v811_v19 = vpop.f32.mrb[4].mxu0  ;;  %v865_v21 = vpop.f32.mrb[5].mxu1 }
 0x18d   :  { %v812_v45 = vpop.f32.mrb[5].mxu0  ;;  %v866_v22 = vadd.f32 %v865_v21, %v864_v20 }
 0x18e   :  { %v813_v49 = vadd.f32 %v812_v45, %v811_v19  ;;  %v575_v50 = vadd.f32 %v863_v17, %v475_v18 }
 0x18f   :  { %v867_v25 = vpop.f32.mrb[6].mxu1 }
 0x190   :  { %v480_v23 = vadd.f32 %v813_v49, %v763_v1  ;;  %v814_v24 = vpop.f32.mrb[6].mxu0  ;;  %v868_v54 = vpop.f32.mrb[7].mxu1 }
 0x191   :  { %v815_v53 = vpop.f32.mrb[7].mxu0  ;;  %v869_v51 = vadd.f32 %v868_v54, %v867_v25 }
 0x192   :  { %v816_v26 = vadd.f32 %v815_v53, %v814_v24  ;;  %v580_v27 = vadd.f32 %v866_v22, %v480_v23 }
 0x193   :  { %v870_v56 = vpop.f32.mrb[8].mxu1 }
 0x194   :  { %v485_v28 = vadd.f32 %v816_v26, %v763_v1  ;;  %v817_v30 = vpop.f32.mrb[8].mxu0  ;;  %v871_v52 = vpop.f32.mrb[9].mxu1 }
 0x195   :  { %v818_v31 = vpop.f32.mrb[9].mxu0  ;;  %v872_v57 = vadd.f32 %v871_v52, %v870_v56 }
 0x196   :  { %v819_v3 = vadd.f32 %v818_v31, %v817_v30  ;;  %v585_v16 = vadd.f32 %v869_v51, %v485_v28 }
 0x197   :  { %v873_v40 = vpop.f32.mrb[10].mxu1 }
 0x198   :  { %v490_v58 = vadd.f32 %v819_v3, %v763_v1  ;;  %v820_v32 = vpop.f32.mrb[10].mxu0  ;;  %v874_v34 = vpop.f32.mrb[11].mxu1 }
 0x199   :  { %v821_v33 = vpop.f32.mrb[11].mxu0  ;;  %v875_v35 = vadd.f32 %v874_v34, %v873_v40 }
 0x19a   :  { %v822_v12 = vadd.f32 %v821_v33, %v820_v32  ;;  %v590_v29 = vadd.f32 %v872_v57, %v490_v58 }
 0x19b   :  { %v876_v38 = vpop.f32.mrb[12].mxu1 }
 0x19c   :  { %v495_v36 = vadd.f32 %v822_v12, %v763_v1  ;;  %v823_v37 = vpop.f32.mrb[12].mxu0  ;;  %v877_v42 = vpop.f32.mrb[13].mxu1 }
 0x19d   :  { %v824_v41 = vpop.f32.mrb[13].mxu0  ;;  %v878_v43 = vadd.f32 %v877_v42, %v876_v38 }
 0x19e   :  { %v825_v59 = vadd.f32 %v824_v41, %v823_v37  ;;  %v595_v44 = vadd.f32 %v875_v35, %v495_v36 }
 0x19f   :  { %v689_v48 = vpop.f32.mrb[14].mxu1 }
 0x1a0   :  { %v500_v46 = vadd.f32 %v825_v59, %v763_v1  ;;  %v669_v47 = vpop.f32.mrb[14].mxu0  ;;  %v690_v10 = vadd.f32 %v689_v48, %v590_v29  ;;  %v936_v60 = vpop.f32.mrb[15].mxu1 }
 0x1a1   :  { %v670_v55 = vadd.f32 %v669_v47, %v570_v9  ;;  %v924_v62 = vpop.f32.mrb[15].mxu0 }
 0x1a2   :  { %v600_v39 = vadd.f32 %v878_v43, %v500_v46  ;;  %v707_v0 = vmax.f32 %v690_v10, 0.0 }
 0x1a3   :  { %v703_v63 = vmax.f32 %v670_v55, 0.0  ;;  %v694_v4 = vpop.f32.mrb[16].mxu1 }
 0x1a4   :  { %v674_v2 = vpop.f32.mrb[16].mxu0  ;;  %v695_v11 = vadd.f32 %v694_v4, %v595_v44  ;;  %v939_v7 = vpop.f32.mrb[17].mxu1  ;;  %v721_v1 = vmul.f32 %v772_v61, %v707_v0 }
 0x1a5   :  { %v675_v5 = vadd.f32 %v674_v2, %v575_v50  ;;  %v927_v6 = vpop.f32.mrb[17].mxu0  ;;  %v717_v8 = vmul.f32 %v772_v61, %v703_v63 }
 0x1a6   :  { %732 = vadd.xlane.f32.xlu0 %v721_v1  ;;  %v708_v53 = vmax.f32 %v695_v11, 0.0 }
 0x1a7   :  { %v704_v13 = vmax.f32 %v675_v5, 0.0  ;;  %724 = vadd.xlane.f32.xlu1 %v717_v8  ;;  %v699_v14 = vpop.f32.mrb[18].mxu1 }
 0x1a8   :  { %v679_v9 = vpop.f32.mrb[18].mxu0  ;;  %v700_v17 = vadd.f32 %v699_v14, %v600_v39  ;;  %v942_v19 = vpop.f32.mrb[19].mxu1  ;;  %v722_v51 = vmul.f32 %v772_v61, %v708_v53 }
 0x1a9   :  { %v680_v15 = vadd.f32 %v679_v9, %v580_v27  ;;  %v930_v18 = vpop.f32.mrb[19].mxu0  ;;  %v718_v20 = vmul.f32 %v772_v61, %v704_v13  ;;  %v740_v27 = vstv %s1436_s7 }
 0x1aa   :  { %v709_v21 = vmax.f32 %v700_v17, 0.0 }
 0x1ab   :  { %v705_v45 = vmax.f32 %v680_v15, 0.0  ;;  %726 = vadd.xlane.f32.xlu0 %v718_v20 }
 0x1ac   :  { %v684_v49 = vpop.f32.mrb[20].mxu0  ;;  %v723_v24 = vmul.f32 %v772_v61, %v709_v21 }
 0x1ad   :  { %v685_v22 = vadd.f32 %v684_v49, %v585_v16  ;;  %v933_v50 = vpop.f32.mrb[21].mxu0  ;;  %v719_v23 = vmul.f32 %v772_v61, %v705_v45 }
 0x1ae   :  { %v736_v26 = vsel %vm399_vm0, %v723_v24, 0.0 }
 0x1af   :  { %v706_v25 = vmax.f32 %v685_v22, 0.0  ;;  %728 = vadd.xlane.f32.xlu0 %v719_v23 }
 0x1b1   :  { %v720_v54 = vmul.f32 %v772_v61, %v706_v25 }
 0x1b3   :  { %737 = vadd.xlane.f32.xlu0 %v736_v26  ;;  %730 = vadd.xlane.f32.xlu1 %v720_v54 }
 0x1b7   :  { %734 = vadd.xlane.f32.xlu1 %v722_v51 }
 0x233   :  { %v733_v28 = vpop.xlane.xlu0 %732 }
 0x234   :  { %v725_v30 = vpop.xlane.xlu1 %724  ;;  %v745_v56 = vadd.f32 %v740_v27, %v733_v28 }
 0x235   :  { %v741_v31 = vadd.f32 %v740_v27, %v725_v30 }
 0x236   :  { %753 = vst.msk [vmem:[%s1437_s8 + $0x20] sm:$0xff] %vm748_vm5, %v745_v56 }
 0x237   :  { %749 = vst.msk [vmem:[%s1437_s8] sm:$0xff] %vm748_vm5, %v741_v31 }
 0x238   :  { %v727_v52 = vpop.xlane.xlu0 %726 }
 0x239   :  { %v742_v3 = vadd.f32 %v740_v27, %v727_v52 }
 0x23b   :  { %750 = vst.msk [vmem:[%s1437_s8 + $0x8] sm:$0xff] %vm748_vm5, %v742_v3 }
 0x23c   :  { %v729_v57 = vpop.xlane.xlu0 %728 }
 0x23d   :  { %v743_v16 = vadd.f32 %v740_v27, %v729_v57 }
 0x23f   :  { %751 = vst.msk [vmem:[%s1437_s8 + $0x10] sm:$0xff] %vm748_vm5, %v743_v16 }
 0x240   :  { %v738_v58 = vpop.xlane.xlu0 %737  ;;  %v731_v32 = vpop.xlane.xlu1 %730 }
 0x241   :  { %v747_v40 = vadd.f32 %v740_v27, %v738_v58  ;;  %v744_v33 = vadd.f32 %v740_v27, %v731_v32 }
 0x243   :  { %756 = vst.msk [vmem:[%s1437_s8 + $0x30] sm:$0x3] %vm755_vm6, %v747_v40 }
 0x244   :  { %752 = vst.msk [vmem:[%s1437_s8 + $0x18] sm:$0xff] %vm748_vm5, %v744_v33  ;;  %v735_v34 = vpop.xlane.xlu1 %734 }
 0x245   :  { %v746_v12 = vadd.f32 %v740_v27, %v735_v34 }
 0x247   :  { %754 = vst.msk [vmem:[%s1437_s8 + $0x28] sm:$0xff] %vm748_vm5, %v746_v12 }
 0x248   :  { %761 = vsyncpa [#allocation4], 1 }
 0x249   :  { %762 = vsyncpa [#allocation6], 1 }

</bundles_post_ra>
